<compile_context>
chip_gen: v5e
topology: v5e:2x2
jax: 0.10.0
libtpu: 0.0.40
codegen_flags: <defaults>
</compile_context>

<pallas_src>
import math
import jax
import jax.numpy as jnp
from jax.experimental import pallas as pl
from jax.experimental.pallas import tpu as pltpu

_GELU_C = math.sqrt(2.0 / math.pi)
_MiB = 1024 * 1024


def _gelu(x):
    # Matches the PyTorch tanh-approximation gelu in the reference code exactly.
    return 0.5 * x * (1.0 + jnp.tanh(_GELU_C * (x + 0.044715 * (x * x * x))))


def _cdiv(a, b):
    return (a + b - 1) // b


def _round_up(a, b):
    return _cdiv(a, b) * b


def _pad_axis(arr, axis, target):
    pad = target - arr.shape[axis]
    if pad <= 0:
        return arr
    widths = [(0, 0)] * arr.ndim
    widths[axis] = (0, pad)
    return jnp.pad(arr, widths)


def _vmem_capacity_bytes():
    """Physical per-core VMEM; falls back to 128 MiB if the query fails."""
    try:
        info = pltpu.get_tpu_info()
        cap = getattr(info, "vmem_capacity_bytes", None)
        if cap:
            return int(cap)
    except Exception:
        pass
    return 128 * _MiB


# ----------------------------- kernels -------------------------------------


def mlp_kernel_acc(x_ref, wfc_ref, bfc_ref, wproj_ref, bproj_ref, o_ref, acc_ref):
    """Grid: (row tiles i, n_state tiles k). acc_ref accumulates across k."""
    k = pl.program_id(1)

    @pl.when(k == 0)
    def _():
        acc_ref[...] = jnp.zeros_like(acc_ref)

    x = x_ref[...]
    # c_fc slice: (TM, nx) @ (nx, TN) -> f32, + bias slice, gelu.
    h = jnp.dot(x, wfc_ref[...], preferred_element_type=jnp.float32) + bfc_ref[...]
    h = _gelu(h)
    # c_proj slice: cast LHS back to the input dtype (native MXU rate for bf16),
    # keep f32 accumulation.
    acc_ref[...] += jnp.dot(
        h.astype(x.dtype), wproj_ref[...], preferred_element_type=jnp.float32
    )

    @pl.when(k == pl.num_programs(1) - 1)
    def _():
        # dropout: identity at inference
        o_ref[...] = (acc_ref[...] + bproj_ref[...]).astype(o_ref.dtype)


def mlp_kernel_single(x_ref, wfc_ref, bfc_ref, wproj_ref, bproj_ref, o_ref):
    """Single n_state tile (grid = row tiles only): no accumulator scratch."""
    x = x_ref[...]
    h = jnp.dot(x, wfc_ref[...], preferred_element_type=jnp.float32) + bfc_ref[...]
    h = _gelu(h)
    o_ref[...] = (
        jnp.dot(h.astype(x.dtype), wproj_ref[...], preferred_element_type=jnp.float32)
        + bproj_ref[...]
    ).astype(o_ref.dtype)


# --------------------------- tile planning ----------------------------------


def _plan_tiles(M, nx_pad, n_state, in_bytes, w_bytes, tm_desired, tn_cap_desired, budget):
    n128 = _round_up(n_state, 128)

    def tn_plan(cap):
        # Split the (128-padded) hidden dim into ks roughly-even lane-aligned
        # tiles; pad n_state up to ks*TN (never collapses TN to 128 for
        # awkward factorizations).
        cap = max(128, min(cap, n128))
        ks = _cdiv(n128, cap)
        tn = _round_up(_cdiv(n128, ks), 128)
        return tn, tn * ks, ks

    TM = min(tm_desired, _round_up(M, 16))
    # Megacore: make sure both TensorCores get at least one row tile when the
    # problem is big enough (prefer the largest TM that still yields >= 2 tiles).
    if M >= 512:
        TM = min(TM, _round_up(_cdiv(M, 2), 16))

    tn_cap = tn_cap_desired
    TN, n_state_pad, ks = tn_plan(tn_cap)

    def usage(tm, tn, multi_k):
        blocks = (
            2 * tm * nx_pad * in_bytes        # x tile (double-buffered)
            + 2 * tm * nx_pad * in_bytes      # out tile
            + 2 * nx_pad * tn * w_bytes       # c_fc weight slice
            + 2 * 8 * tn * 4                  # c_fc bias slice
            + 2 * tn * nx_pad * w_bytes       # c_proj weight slice
            + 2 * 8 * nx_pad * 4              # c_proj bias
        )
        scratch = tm * nx_pad * 4 if multi_k else 0
        internal = tm * tn * 4 + tm * tn * in_bytes  # f32 gelu slab + cast copy
        return blocks + scratch + internal

    # Shrink TN first (keeps TM large so weights are re-streamed from HBM less
    # often), then TM, until the working set fits the VMEM budget.
    while usage(TM, TN, ks > 1) > budget:
        if tn_cap > 512:
            tn_cap //= 2
            TN, n_state_pad, ks = tn_plan(tn_cap)
        elif TM > 256:
            TM = max(256, _round_up(TM // 2, 16))
        elif tn_cap > 128:
            tn_cap //= 2
            TN, n_state_pad, ks = tn_plan(tn_cap)
        elif TM > 16:
            TM = max(16, _round_up(TM // 2, 16))
        else:
            break

    return TM, TN, n_state_pad, ks


# ----------------------------- wrapper --------------------------------------


def mlp_pallas(x, w_fc, b_fc, w_proj, b_proj, *, tm=1024, tn_max=2048):
    """x: [B, T, nx] -> [B, T, nx]; fused c_fc -> gelu -> c_proj (+ identity dropout)."""
    B, T, nx = x.shape
    n_state = w_fc.shape[1]
    M = B * T

    in_bytes = jnp.dtype(x.dtype).itemsize
    w_bytes = jnp.dtype(w_fc.dtype).itemsize

    # Lane-dense output / accumulator: pad nx up to a multiple of 128.
    nx_pad = _round_up(nx, 128)

    # Generation-aware VMEM budget (v5e/v6e: 128 MiB physical; v7x: 64 MiB).
    vmem_cap = _vmem_capacity_bytes()
    if vmem_cap >= 96 * _MiB:
        vmem_limit = 100 * _MiB
    else:
        vmem_limit = max(32 * _MiB, min(48 * _MiB, vmem_cap - 8 * _MiB))
    budget = vmem_limit - 4 * _MiB  # headroom for Mosaic internal scratch

    TM, TN, n_state_pad, ks = _plan_tiles(
        M, nx_pad, n_state, in_bytes, w_bytes, tm, tn_max, budget
    )
    M_pad = _round_up(M, TM)

    # Zero padding is correctness-neutral: padded x columns hit zero w_fc rows;
    # padded w_fc columns / b_fc entries give gelu(0)=0 hidden columns that meet
    # zero w_proj rows; padded w_proj / output columns are sliced off; padded
    # rows of x are sliced off.
    x2d = _pad_axis(_pad_axis(x.reshape(M, nx), 1, nx_pad), 0, M_pad)
    w_fc_p = _pad_axis(_pad_axis(w_fc, 0, nx_pad), 1, n_state_pad)
    b_fc_p = _pad_axis(b_fc.reshape(1, n_state), 1, n_state_pad)
    w_proj_p = _pad_axis(_pad_axis(w_proj, 0, n_state_pad), 1, nx_pad)
    b_proj_p = _pad_axis(b_proj.reshape(1, nx), 1, nx_pad)

    out_shape = jax.ShapeDtypeStruct((M_pad, nx_pad), x.dtype)
    m_tiles = M_pad // TM

    if ks == 1:
        # Fast path: whole hidden dim in one tile -> no accumulator scratch,
        # no init/finalize passes over the output tile.
        grid_spec = pltpu.PrefetchScalarGridSpec(
            num_scalar_prefetch=0,
            grid=(m_tiles,),
            in_specs=[
                pl.BlockSpec((TM, nx_pad), lambda i: (i, 0)),      # x row tile
                pl.BlockSpec((nx_pad, TN), lambda i: (0, 0)),      # c_fc weight (resident)
                pl.BlockSpec((1, TN), lambda i: (0, 0)),           # c_fc bias (resident)
                pl.BlockSpec((TN, nx_pad), lambda i: (0, 0)),      # c_proj weight (resident)
                pl.BlockSpec((1, nx_pad), lambda i: (0, 0)),       # c_proj bias (resident)
            ],
            out_specs=pl.BlockSpec((TM, nx_pad), lambda i: (i, 0)),
        )
        kernel = mlp_kernel_single
        semantics = ("parallel",)
    else:
        grid_spec = pltpu.PrefetchScalarGridSpec(
            num_scalar_prefetch=0,
            grid=(m_tiles, ks),
            in_specs=[
                pl.BlockSpec((TM, nx_pad), lambda i, k: (i, 0)),   # x row tile (resident across k)
                pl.BlockSpec((nx_pad, TN), lambda i, k: (0, k)),   # c_fc weight slice
                pl.BlockSpec((1, TN), lambda i, k: (0, k)),        # c_fc bias slice
                pl.BlockSpec((TN, nx_pad), lambda i, k: (k, 0)),   # c_proj weight slice
                pl.BlockSpec((1, nx_pad), lambda i, k: (0, 0)),    # c_proj bias (resident)
            ],
            out_specs=pl.BlockSpec((TM, nx_pad), lambda i, k: (i, 0)),
            scratch_shapes=[pltpu.VMEM((TM, nx_pad), jnp.float32)],
        )
        kernel = mlp_kernel_acc
        semantics = ("parallel", "arbitrary")

    out2d = pl.pallas_call(
        kernel,
        out_shape=out_shape,
        grid_spec=grid_spec,
        compiler_params=pltpu.CompilerParams(
            dimension_semantics=semantics,
            vmem_limit_bytes=vmem_limit,
        ),
    )(x2d, w_fc_p, b_fc_p, w_proj_p, b_proj_p)

    return out2d[:M, :nx].reshape(B, T, nx)


def mlp_reference(x, w_fc, b_fc, w_proj, b_proj):
    xf = x.astype(jnp.float32)
    h = _gelu(jnp.einsum("btk,kn->btn", xf, w_fc.astype(jnp.float32)) + b_fc)
    return jnp.einsum("btn,nk->btk", h, w_proj.astype(jnp.float32)) + b_proj


if __name__ == "__main__":
    # Small shapes consistent with the module: cfg.n_embd = nx, n_state = 4*nx
    B, T, nx = 2, 8, 32
    n_state = 4 * nx  # 128

    key = jax.random.PRNGKey(0)
    kx, kwfc, kwproj = jax.random.split(key, 3)

    x = jax.random.normal(kx, (B, T, nx), dtype=jnp.float32)
    # Conv1D init: normal(std=0.02) weights, zero bias (deterministic via PRNGKey)
    w_fc = 0.02 * jax.random.normal(kwfc, (nx, n_state), dtype=jnp.float32)
    b_fc = jnp.zeros((n_state,), dtype=jnp.float32)
    w_proj = 0.02 * jax.random.normal(kwproj, (n_state, nx), dtype=jnp.float32)
    b_proj = jnp.zeros((nx,), dtype=jnp.float32)

    # f32 check
    out = jax.block_until_ready(mlp_pallas(x, w_fc, b_fc, w_proj, b_proj))
    ref = mlp_reference(x, w_fc, b_fc, w_proj, b_proj)
    assert out.shape == (B, T, nx)
    assert jnp.allclose(out, ref, atol=1e-5, rtol=1e-4), "f32 mismatch vs reference"

    # bf16 check (mixed-precision path: bf16 MXU inputs, f32 accumulate)
    xb, wfcb, wprojb = (a.astype(jnp.bfloat16) for a in (x, w_fc, w_proj))
    out_bf16 = jax.block_until_ready(mlp_pallas(xb, wfcb, b_fc, wprojb, b_proj))
    ref_bf16 = mlp_reference(xb, wfcb, b_fc, wprojb, b_proj)
    assert out_bf16.dtype == jnp.bfloat16
    assert jnp.allclose(
        out_bf16.astype(jnp.float32), ref_bf16, atol=2e-2, rtol=5e-2
    ), "bf16 mismatch vs reference"

    print("KERNEL_OK")
</pallas_src>

<mosaic_0001>
module attributes {stable_mosaic.version = 11 : i64} {
  func.func @mlp_kernel_single(%arg0: i32, %arg1: memref<16x128xf32, #tpu.memory_space<vmem>>, %arg2: memref<128x128xf32, #tpu.memory_space<vmem>>, %arg3: memref<1x128xf32, #tpu.memory_space<vmem>>, %arg4: memref<128x128xf32, #tpu.memory_space<vmem>>, %arg5: memref<1x128xf32, #tpu.memory_space<vmem>>, %arg6: memref<16x128xf32, #tpu.memory_space<vmem>>) attributes {dimension_semantics = [#tpu.dimension_semantics<parallel>], iteration_bounds = array<i64: 1>, scalar_prefetch = 0 : i64, scratch_operands = 0 : i64, tpu.core_type = #tpu.core_type<tc>, window_params = [{transform_indices = @transform_0, window_bounds = array<i64: 16, 128>}, {pipeline_mode = #tpu.pipeline_mode<synchronous>, transform_indices = @transform_1, window_bounds = array<i64: 128, 128>}, {pipeline_mode = #tpu.pipeline_mode<synchronous>, transform_indices = @transform_2, window_bounds = array<i64: 1, 128>}, {pipeline_mode = #tpu.pipeline_mode<synchronous>, transform_indices = @transform_3, window_bounds = array<i64: 128, 128>}, {pipeline_mode = #tpu.pipeline_mode<synchronous>, transform_indices = @transform_4, window_bounds = array<i64: 1, 128>}, {transform_indices = @transform_5, window_bounds = array<i64: 16, 128>}]} {
    %c0 = arith.constant 0 : index
    %c0_0 = arith.constant 0 : index
    %0 = vector.load %arg1[%c0, %c0_0] : memref<16x128xf32, #tpu.memory_space<vmem>>, vector<16x128xf32>
    %c0_1 = arith.constant 0 : index
    %c0_2 = arith.constant 0 : index
    %1 = vector.load %arg2[%c0_1, %c0_2] : memref<128x128xf32, #tpu.memory_space<vmem>>, vector<128x128xf32>
    %cst = arith.constant dense<0.000000e+00> : vector<16x128xf32>
    %2 = tpu.matmul %0, %1, %cst {dimension_numbers = #tpu.dot_dimension_numbers<[1], [0], [0], [1], [0, 0, 1, 1], [], []>} : vector<16x128xf32>, vector<128x128xf32>, vector<16x128xf32> -> vector<16x128xf32>
    %c0_3 = arith.constant 0 : index
    %c0_4 = arith.constant 0 : index
    %3 = vector.load %arg3[%c0_3, %c0_4] : memref<1x128xf32, #tpu.memory_space<vmem>>, vector<1x128xf32>
    %4 = vector.broadcast %3 : vector<1x128xf32> to vector<16x128xf32>
    %5 = arith.addf %2, %4 : vector<16x128xf32>
    %cst_5 = arith.constant 5.000000e-01 : f32
    %6 = vector.broadcast %cst_5 : f32 to vector<16x128xf32>
    %7 = arith.mulf %6, %5 : vector<16x128xf32>
    %8 = arith.mulf %5, %5 : vector<16x128xf32>
    %9 = arith.mulf %8, %5 : vector<16x128xf32>
    %cst_6 = arith.constant 4.471500e-02 : f32
    %10 = vector.broadcast %cst_6 : f32 to vector<16x128xf32>
    %11 = arith.mulf %10, %9 : vector<16x128xf32>
    %12 = arith.addf %5, %11 : vector<16x128xf32>
    %cst_7 = arith.constant 0.797884583 : f32
    %13 = vector.broadcast %cst_7 : f32 to vector<16x128xf32>
    %14 = arith.mulf %13, %12 : vector<16x128xf32>
    %15 = math.tanh %14 : vector<16x128xf32>
    %cst_8 = arith.constant 1.000000e+00 : f32
    %16 = vector.broadcast %cst_8 : f32 to vector<16x128xf32>
    %17 = arith.addf %16, %15 : vector<16x128xf32>
    %18 = arith.mulf %7, %17 : vector<16x128xf32>
    %c0_9 = arith.constant 0 : index
    %c0_10 = arith.constant 0 : index
    %19 = vector.load %arg4[%c0_9, %c0_10] : memref<128x128xf32, #tpu.memory_space<vmem>>, vector<128x128xf32>
    %cst_11 = arith.constant dense<0.000000e+00> : vector<16x128xf32>
    %20 = tpu.matmul %18, %19, %cst_11 {dimension_numbers = #tpu.dot_dimension_numbers<[1], [0], [0], [1], [0, 0, 1, 1], [], []>} : vector<16x128xf32>, vector<128x128xf32>, vector<16x128xf32> -> vector<16x128xf32>
    %c0_12 = arith.constant 0 : index
    %c0_13 = arith.constant 0 : index
    %21 = vector.load %arg5[%c0_12, %c0_13] : memref<1x128xf32, #tpu.memory_space<vmem>>, vector<1x128xf32>
    %22 = vector.broadcast %21 : vector<1x128xf32> to vector<16x128xf32>
    %23 = arith.addf %20, %22 : vector<16x128xf32>
    %c0_14 = arith.constant 0 : index
    %c0_15 = arith.constant 0 : index
    %24 = vector.load %arg6[%c0_14, %c0_15] : memref<16x128xf32, #tpu.memory_space<vmem>>, vector<16x128xf32>
    tpu.vector_store %arg6[%c0_14, %c0_15], %23 {strides = array<i32>} : memref<16x128xf32, #tpu.memory_space<vmem>>, vector<16x128xf32>,
    return
  }
  func.func @transform_0(%arg0: i32) -> (i32, i32) {
    %c0_i32 = arith.constant 0 : i32
    %c0_i32_0 = arith.constant 0 : i32
    return %arg0, %c0_i32 : i32, i32
  }
  func.func @transform_1(%arg0: i32) -> (i32, i32) {
    %c0_i32 = arith.constant 0 : i32
    %c0_i32_0 = arith.constant 0 : i32
    %c0_i32_1 = arith.constant 0 : i32
    return %c0_i32, %c0_i32_0 : i32, i32
  }
  func.func @transform_2(%arg0: i32) -> (i32, i32) {
    %c0_i32 = arith.constant 0 : i32
    %c0_i32_0 = arith.constant 0 : i32
    %c0_i32_1 = arith.constant 0 : i32
    return %c0_i32, %c0_i32_0 : i32, i32
  }
  func.func @transform_3(%arg0: i32) -> (i32, i32) {
    %c0_i32 = arith.constant 0 : i32
    %c0_i32_0 = arith.constant 0 : i32
    %c0_i32_1 = arith.constant 0 : i32
    return %c0_i32, %c0_i32_0 : i32, i32
  }
  func.func @transform_4(%arg0: i32) -> (i32, i32) {
    %c0_i32 = arith.constant 0 : i32
    %c0_i32_0 = arith.constant 0 : i32
    %c0_i32_1 = arith.constant 0 : i32
    return %c0_i32, %c0_i32_0 : i32, i32
  }
  func.func @transform_5(%arg0: i32) -> (i32, i32) {
    %c0_i32 = arith.constant 0 : i32
    %c0_i32_0 = arith.constant 0 : i32
    return %arg0, %c0_i32 : i32, i32
  }
}

</mosaic_0001>

<bundles_post_ra>
// kernel: tpu_custom_call.1
= control target key start
LH: loop header
LB: loop body
LE: loop exit
PB: predicated region body
PF: predicated region fallthrough
CT: control target
= control target key end

     0   :  { %10 = vsyncpa [#allocation3], 0  ;;  %s408_s0 = inlined_call_operand.hbm [shape: f32[16,128], index: 0, kind: input, shape index: {}]   ;;  %s409_s1 = inlined_call_operand.hbm [shape: f32[128,128], index: 1, kind: input, shape index: {}]   ;;  %s410_s2 = inlined_call_operand.vmem [shape: f32[1,128], index: 2, kind: input, shape index: {}]   ;;  %s411_s3 = inlined_call_operand.hbm [shape: f32[128,128], index: 3, kind: input, shape index: {}]   ;;  %s412_s4 = inlined_call_operand.vmem [shape: f32[1,128], index: 4, kind: input, shape index: {}]   ;;  %s413_s5 = inlined_call_operand.hbm [shape: f32[16,128], index: 5, kind: output, shape index: {}]  }
   0x1   :  { %11 = vsyncpa [#allocation6], 0 }
   0x2   :  { %12 = vsyncpa [#allocation4], 0  ;;  %s30_s20 = sshll.u32 %s409_s1, 4  ;;  %s342_s21 = smov [#allocation5]   ;;  %s31_s20 = int_to_ptr.hbm [resolvable:$true] %s30_s20 }
   0x3   :  { %s32_s22 = sshll.u32 %s342_s21, 4  ;;  %s17_s25 = sshll.u32 %s408_s0, 4  ;;  %s33_s22 = int_to_ptr.vmem [resolvable:$true] %s32_s22  ;;  %s18_s25 = int_to_ptr.hbm [resolvable:$true] %s17_s25 }
   0x4   :  { %s343_s26 = smov 128   ;;  %s344_s27 = smov 8  }
   0x5   :  { %38 = dma.hbm_to_vmem [thread:$0]  %s31_s20, 2048, %s33_s22, [#allocation6], %s343_s26, %s343_s26, %s344_s27  }
   0x6   :  { %s345_s28 = smov [#allocation2]   ;;  %s45_s1 = sshll.u32 %s411_s3, 4  ;;  %s46_s1 = int_to_ptr.hbm [resolvable:$true] %s45_s1 }
   0x7   :  { %s19_s29 = sshll.u32 %s345_s28, 4  ;;  %s346_s0 = smov [#allocation7]   ;;  %s20_s29 = int_to_ptr.vmem [resolvable:$true] %s19_s29 }
   0x8   :  { %25 = dma.hbm_to_vmem [thread:$0]  %s18_s25, 256, %s20_s29, [#allocation3], %s343_s26, %s343_s26, %s344_s27  }
   0x9   :  { %s47_s7 = sshll.u32 %s346_s0, 4  ;;  %s48_s7 = int_to_ptr.vmem [resolvable:$true] %s47_s7 }
   0xa   :  { %53 = dma.hbm_to_vmem [thread:$0]  %s46_s1, 2048, %s48_s7, [#allocation6], %s343_s26, %s343_s26, %s344_s27  }
   0xb   :  { %336 = dma.done.wait [#allocation3], 256  }
   0xc   :  { %337 = vsyncadd [#allocation3], 4294967040 }
   0xd   :  { %338 = dma.done.wait [#allocation6], 4096  }
   0xe   :  { %339 = vsyncadd [#allocation6], 4294963200  ;;  %v85_v0 = vld [vmem:[#allocation5 + $0x78] sm:$0xff]  ;;  %v84_v1 = vld [vmem:[#allocation5 + $0x70] sm:$0xff]  ;;  %s347_s10 = smov [#allocation8]   ;;  %s182_s14 = sshll.u32 %s413_s5, 4  ;;  %s183_s14 = int_to_ptr.hbm [resolvable:$true] %s182_s14 }
   0xf   :  { %90 = vmatpush.msra.mxu0 %v85_v0  ;;  %196 = vmatpush.msra.mxu2 %v85_v0  ;;  %v83_v2 = vld [vmem:[#allocation5 + $0x68] sm:$0xff]  ;;  %v82_v3 = vld [vmem:[#allocation5 + $0x60] sm:$0xff]  ;;  %v81_v4 = vld [vmem:[#allocation5 + $0x58] sm:$0xff]  ;;  %s180_s11 = sshll.u32 %s347_s10, 4  ;;  %s181_s11 = int_to_ptr.vmem [resolvable:$true] %s180_s11 }
  0x10   :  { %v146_v5 = vld [vmem:[#allocation7 + $0x78] sm:$0xff]  ;;  %v145_v6 = vld [vmem:[#allocation7 + $0x70] sm:$0xff]  ;;  %v144_v8 = vld [vmem:[#allocation7 + $0x68] sm:$0xff] }
  0x11   :  { %91 = vmatpush.msra.mxu0 %v84_v1  ;;  %197 = vmatpush.msra.mxu2 %v84_v1  ;;  %v80_v7 = vld [vmem:[#allocation5 + $0x50] sm:$0xff]  ;;  %v79_v9 = vld [vmem:[#allocation5 + $0x48] sm:$0xff]  ;;  %v143_v10 = vld [vmem:[#allocation7 + $0x60] sm:$0xff] }
  0x12   :  { %151 = vmatpush.msra.mxu1 %v146_v5  ;;  %212 = vmatpush.msra.mxu3 %v146_v5  ;;  %v78_v11 = vld [vmem:[#allocation5 + $0x40] sm:$0xff]  ;;  %v77_v12 = vld [vmem:[#allocation5 + $0x38] sm:$0xff]  ;;  %v76_v13 = vld [vmem:[#allocation5 + $0x30] sm:$0xff] }
  0x13   :  { %92 = vmatpush.msra.mxu0 %v83_v2  ;;  %198 = vmatpush.msra.mxu2 %v83_v2  ;;  %v75_v14 = vld [vmem:[#allocation5 + $0x28] sm:$0xff]  ;;  %v74_v15 = vld [vmem:[#allocation5 + $0x20] sm:$0xff]  ;;  %v73_v16 = vld [vmem:[#allocation5 + $0x18] sm:$0xff] }
  0x14   :  { %152 = vmatpush.msra.mxu1 %v145_v6  ;;  %213 = vmatpush.msra.mxu3 %v145_v6  ;;  %v72_v17 = vld [vmem:[#allocation5 + $0x10] sm:$0xff]  ;;  %v71_v18 = vld [vmem:[#allocation5 + $0x8] sm:$0xff]  ;;  %v70_v19 = vld [vmem:[#allocation5] sm:$0xff] }
  0x15   :  { %93 = vmatpush.msra.mxu0 %v82_v3  ;;  %199 = vmatpush.msra.mxu2 %v82_v3  ;;  %v68_v20 = vld [vmem:[#allocation2] sm:$0xff]  ;;  %v69_v21 = vld [vmem:[#allocation2 + $0x8] sm:$0xff]  ;;  %v140_v24 = vld [vmem:[#allocation7 + $0x48] sm:$0xff] }
  0x16   :  { %153 = vmatpush.msra.mxu1 %v144_v8  ;;  %214 = vmatpush.msra.mxu3 %v144_v8  ;;  %v142_v22 = vld [vmem:[#allocation7 + $0x58] sm:$0xff]  ;;  %v141_v23 = vld [vmem:[#allocation7 + $0x50] sm:$0xff]  ;;  %v139_v25 = vld [vmem:[#allocation7 + $0x40] sm:$0xff] }
  0x17   :  { %94 = vmatpush.msra.mxu0 %v81_v4  ;;  %200 = vmatpush.msra.mxu2 %v81_v4  ;;  %v138_v26 = vld [vmem:[#allocation7 + $0x38] sm:$0xff]  ;;  %v137_v27 = vld [vmem:[#allocation7 + $0x30] sm:$0xff]  ;;  %v136_v28 = vld [vmem:[#allocation7 + $0x28] sm:$0xff] }
  0x18   :  { %154 = vmatpush.msra.mxu1 %v143_v10  ;;  %215 = vmatpush.msra.mxu3 %v143_v10  ;;  %v135_v29 = vld [vmem:[#allocation7 + $0x20] sm:$0xff]  ;;  %v134_v30 = vld [vmem:[#allocation7 + $0x18] sm:$0xff]  ;;  %v133_v31 = vld [vmem:[#allocation7 + $0x10] sm:$0xff] }
  0x19   :  { %95 = vmatpush.msra.mxu0 %v80_v7  ;;  %201 = vmatpush.msra.mxu2 %v80_v7  ;;  %v132_v32 = vld [vmem:[#allocation7 + $0x8] sm:$0xff]  ;;  %v131_v33 = vld [vmem:[#allocation7] sm:$0xff]  ;;  %v234_v34 = vld [vmem:[%s410_s2] ss:$0 sm:$0xff] }
  0x1a   :  { %155 = vmatpush.msra.mxu1 %v142_v22  ;;  %216 = vmatpush.msra.mxu3 %v142_v22  ;;  %v235_v57 = vld [vmem:[%s412_s4] ss:$0 sm:$0xff] }
  0x1b   :  { %96 = vmatpush.msra.mxu0 %v79_v9  ;;  %202 = vmatpush.msra.mxu2 %v79_v9 }
  0x1c   :  { %156 = vmatpush.msra.mxu1 %v141_v23  ;;  %217 = vmatpush.msra.mxu3 %v141_v23 }
  0x1d   :  { %97 = vmatpush.msra.mxu0 %v78_v11  ;;  %203 = vmatpush.msra.mxu2 %v78_v11 }
  0x1e   :  { %157 = vmatpush.msra.mxu1 %v140_v24  ;;  %218 = vmatpush.msra.mxu3 %v140_v24 }
  0x1f   :  { %98 = vmatpush.msra.mxu0 %v77_v12  ;;  %204 = vmatpush.msra.mxu2 %v77_v12 }
  0x20   :  { %158 = vmatpush.msra.mxu1 %v139_v25  ;;  %219 = vmatpush.msra.mxu3 %v139_v25 }
  0x21   :  { %99 = vmatpush.msra.mxu0 %v76_v13  ;;  %205 = vmatpush.msra.mxu2 %v76_v13 }
  0x22   :  { %159 = vmatpush.msra.mxu1 %v138_v26  ;;  %220 = vmatpush.msra.mxu3 %v138_v26 }
  0x23   :  { %100 = vmatpush.msra.mxu0 %v75_v14  ;;  %206 = vmatpush.msra.mxu2 %v75_v14 }
  0x24   :  { %160 = vmatpush.msra.mxu1 %v137_v27  ;;  %221 = vmatpush.msra.mxu3 %v137_v27 }
  0x25   :  { %101 = vmatpush.msra.mxu0 %v74_v15  ;;  %207 = vmatpush.msra.mxu2 %v74_v15 }
  0x26   :  { %161 = vmatpush.msra.mxu1 %v136_v28  ;;  %222 = vmatpush.msra.mxu3 %v136_v28 }
  0x27   :  { %102 = vmatpush.msra.mxu0 %v73_v16  ;;  %208 = vmatpush.msra.mxu2 %v73_v16 }
  0x28   :  { %162 = vmatpush.msra.mxu1 %v135_v29  ;;  %223 = vmatpush.msra.mxu3 %v135_v29 }
  0x29   :  { %103 = vmatpush.msra.mxu0 %v72_v17  ;;  %209 = vmatpush.msra.mxu2 %v72_v17 }
  0x2a   :  { %163 = vmatpush.msra.mxu1 %v134_v30  ;;  %224 = vmatpush.msra.mxu3 %v134_v30 }
  0x2b   :  { %104 = vmatpush.msra.mxu0 %v71_v18  ;;  %210 = vmatpush.msra.mxu2 %v71_v18 }
  0x2c   :  { %164 = vmatpush.msra.mxu1 %v133_v31  ;;  %225 = vmatpush.msra.mxu3 %v133_v31 }
  0x2d   :  { %105 = vmatpush.msra.mxu0 %v70_v19  ;;  %211 = vmatpush.msra.mxu2 %v70_v19 }
  0x2e   :  { %106 = vmatmul.f32.vlgmr.msra.gmra.mxu0 %v68_v20  ;;  %109 = vmatmul.f32.vlgmr.msra.gmra.mxu2 %v69_v21 }
  0x2f   :  { %165 = vmatpush.msra.mxu1 %v132_v32  ;;  %226 = vmatpush.msra.mxu3 %v132_v32 }
  0x31   :  { %166 = vmatpush.msra.mxu1 %v131_v33  ;;  %227 = vmatpush.msra.mxu3 %v131_v33 }
  0xab   :  { %v107_v35 = vpop.f32.mrf.mxu0 }
  0xac   :  { %v108_v36 = vadd.f32 %v234_v34, %v107_v35 }
  0xae   :  { %v115_v37 = vmul.f32 %v108_v36, %v108_v36  ;;  %v113_v50 = vmul.f32 0.5, %v108_v36 }
  0xb0   :  { %v117_v38 = vmul.f32 %v115_v37, %v108_v36 }
  0xb1   :  { %v110_v39 = vpop.f32.mrf.mxu2 }
  0xb2   :  { %v111_v40 = vadd.f32 %v234_v34, %v110_v39  ;;  %v119_v41 = vmul.f32 0.044715, %v117_v38 }
  0xb4   :  { %v116_v42 = vmul.f32 %v111_v40, %v111_v40  ;;  %v121_v43 = vadd.f32 %v119_v41, %v108_v36  ;;  %v114_v54 = vmul.f32 0.5, %v111_v40 }
  0xb6   :  { %v118_v44 = vmul.f32 %v116_v42, %v111_v40  ;;  %v123_v45 = vmul.f32 0.7978846, %v121_v43 }
  0xb8   :  { %236 = vtanh.f32 %v123_v45  ;;  %v120_v46 = vmul.f32 0.044715, %v118_v44 }
  0xba   :  { %v122_v47 = vadd.f32 %v120_v46, %v111_v40 }
  0xbc   :  { %v124_v48 = vmul.f32 0.7978846, %v122_v47 }
  0xbe   :  { %v237_v49 = vpop.eup %236  ;;  %238 = vtanh.f32 %v124_v48 }
  0xbf   :  { %v127_v51 = vadd.f32 1.0, %v237_v49 }
  0xc1   :  { %v129_v52 = vmul.f32 %v127_v51, %v113_v50 }
  0xc3   :  { %167 = vmatmul.f32.vlgmr.msra.gmra.mxu1 %v129_v52 }
  0xc4   :  { %v239_v53 = vpop.eup %238 }
  0xc5   :  { %v128_v55 = vadd.f32 1.0, %v239_v53 }
  0xc7   :  { %v130_v56 = vmul.f32 %v128_v55, %v114_v54 }
  0xc9   :  { %170 = vmatmul.f32.vlgmr.msra.gmra.mxu3 %v130_v56 }
 0x140   :  { %v168_v58 = vpop.f32.mrf.mxu1 }
 0x141   :  { %v169_v59 = vadd.f32 %v235_v57, %v168_v58 }
 0x143   :  { %174 = vst [vmem:[#allocation8] sm:$0xff] %v169_v59 }
 0x14c   :  { %v171_v60 = vpop.f32.mrf.mxu3 }
 0x14d   :  { %v172_v61 = vadd.f32 %v235_v57, %v171_v60 }
 0x14f   :  { %175 = vst [vmem:[#allocation8 + $0x8] sm:$0xff] %v172_v61 }
 0x150   :  { %188 = dma.vmem_to_hbm [thread:$0]  %s181_s11, 256, %s183_s14, [#allocation4], %s343_s26, %s343_s26, %s344_s27  }
 0x151   :  { %340 = dma.done.wait [#allocation4], 256  }
 0x152   :  { %341 = vsyncadd [#allocation4], 4294967040 }
 0x153   :  { %193 = vsyncpa [#allocation3], 1 }
 0x154   :  { %194 = vsyncpa [#allocation6], 1 }
 0x155   :  { %195 = vsyncpa [#allocation4], 1 }

</bundles_post_ra>
